<compile_context>
chip_gen: v6e
topology: v6e:2x2x1
jax: 0.10.0
libtpu: 0.0.40
codegen_flags: <defaults>
</compile_context>

<pallas_src>
import functools

import jax
import jax.numpy as jnp
import numpy as np
from jax.experimental import pallas as pl
from jax.experimental.pallas import tpu as pltpu


LANE = 128
CHUNK_ROWS = 512          # 512 x 128 f32 = 256 KiB live intermediate per chunk
_MIB = 1024 * 1024


@functools.lru_cache(maxsize=1)
def _is_v7x():
    try:
        kind = jax.devices()[0].device_kind.lower()
    except Exception:  # no backend yet / CPU interpret
        return False
    return ("v7" in kind) or ("tpu7" in kind)


def _tile_bytes():
    # v7x HBM ~3.2 TB/s: 4 MiB tiles are still step-overhead-shaded, go bigger.
    return (8 * _MIB) if _is_v7x() else (4 * _MIB)


def _vmem_limit_bytes():
    # 2x tile (double buffer) + logits/targets/partials, with ample headroom.
    return (48 * _MIB) if _is_v7x() else (40 * _MIB)


def _weight_axis_semantics():
    # Plain "parallel" vs "arbitrary" is codegen-neutral; only CORE_PARALLEL
    # actually shards the grid across v7x's two TensorCores.
    return pltpu.CORE_PARALLEL if _is_v7x() else "parallel"


def _default_tile_rows(dtype):
    itemsize = jnp.dtype(dtype).itemsize
    rows = _tile_bytes() // (LANE * itemsize)
    # Keep it a multiple of CHUNK_ROWS (true for all supported itemsizes).
    return (rows // CHUNK_ROWS) * CHUNK_ROWS


def _centroid_loss_kernel(lam_ref, logits_ref, target_ref, w_ref, out_ref):
    """One grid step = one (tile_rows, 128) weight tile.

    Every step writes a lane-dense (8, 128) block of lambda-scaled partial L1
    sums; step 0 additionally folds the cross-entropy term into element [0, 0].
    The wrapper sums the partial-output array to get the scalar loss.
    """
    i = pl.program_id(0)
    lam = lam_ref[0]

    # --- L1 partial sum for this weight tile -------------------------------
    # Statically-unrolled chunk loop: each chunk is loaded, |.|'d and folded
    # into a single (8, 128) f32 accumulator, so live VMEM intermediates stay
    # CHUNK-sized (<=256 KiB) instead of tile-sized (4-8 MiB).  Compute is a
    # handful of VPU adds per chunk and stays hidden under the weight DMA.
    tr = w_ref.shape[0]
    n_chunks = tr // CHUNK_ROWS
    acc = jnp.zeros((8, LANE), jnp.float32)
    for j in range(n_chunks):                       # static -> static slices
        c = w_ref[pl.ds(j * CHUNK_ROWS, CHUNK_ROWS), :].astype(jnp.float32)
        acc = acc + jnp.sum(jnp.abs(c).reshape(CHUNK_ROWS // 8, 8, LANE), axis=0)
    part = lam * acc

    @pl.when(i == 0)
    def _():
        # --- cross entropy (mean reduction), numerically stable ------------
        # NOTE: assumes the (N, C) logits block fits VMEM (true for
        # classification heads).  Tile over rows / online-LSE if C is
        # vocab-scale.
        # TODO(synk): F.cross_entropy's ignore_index / out-of-range targets are
        # not handled (not used by this module's training loop).
        logits = logits_ref[...].astype(jnp.float32)        # (N, C)
        tgt = target_ref[...]                               # (N, 1) int32
        n, c = logits.shape
        col = jax.lax.broadcasted_iota(jnp.int32, (n, c), 1)
        m = jnp.max(logits, axis=-1, keepdims=True)
        lse = m + jnp.log(jnp.sum(jnp.exp(logits - m), axis=-1, keepdims=True))
        tgt_logit = jnp.sum(jnp.where(col == tgt, logits, 0.0),
                            axis=-1, keepdims=True)
        ce = jnp.sum(lse - tgt_logit) * (1.0 / n)            # mean over batch

        sub = jax.lax.broadcasted_iota(jnp.int32, (8, LANE), 0)
        lane = jax.lax.broadcasted_iota(jnp.int32, (8, LANE), 1)
        out_ref[...] = part + jnp.where((sub == 0) & (lane == 0), ce, 0.0)

    @pl.when(i != 0)
    def _():
        out_ref[...] = part


def pack_conv_weights(conv_weights):
    """Pack all Conv2d weights into a lane-dense (rows, 128) slab.

    Do this ONCE per weight update (or keep the slab as canonical storage);
    only the packed slab is streamed by the loss kernel, so the hot path pays
    no repack HBM traffic.  The slab keeps the weights' native (common) dtype
    so bf16 models stream half the bytes; zero padding is harmless for |.|.
    Returns (slab, tile_rows).
    """
    dtype = jnp.result_type(*(w.dtype for w in conv_weights))
    blocks = []
    for w in conv_weights:
        flat = w.reshape(-1).astype(dtype)
        pad = (-flat.shape[0]) % LANE                    # <128 tail pad per weight
        if pad:
            flat = jnp.pad(flat, (0, pad))
        blocks.append(flat.reshape(-1, LANE))
    slab = jnp.concatenate(blocks, axis=0)

    rows = slab.shape[0]
    # Round rows up to a CHUNK_ROWS multiple (<=255 KiB of zeros), then to a
    # whole number of tiles.  tile_rows is always a CHUNK_ROWS multiple.
    rows_c = ((rows + CHUNK_ROWS - 1) // CHUNK_ROWS) * CHUNK_ROWS
    tile_rows = min(_default_tile_rows(dtype), rows_c)
    rows_padded = ((rows_c + tile_rows - 1) // tile_rows) * tile_rows
    if rows_padded != rows:
        slab = jnp.pad(slab, ((0, rows_padded - rows), (0, 0)))
    return slab, tile_rows


def centroid_loss(logits, target, w_slab, tile_rows, lambda_l1):
    """logits: (N, C), target: (N,) int, w_slab: (rows, 128) packed weights."""
    n, c = logits.shape
    target2d = target.astype(jnp.int32).reshape(n, 1)
    rows = w_slab.shape[0]
    assert rows % tile_rows == 0 and tile_rows % CHUNK_ROWS == 0
    num_tiles = rows // tile_rows
    lam = jnp.asarray(lambda_l1, jnp.float32).reshape(1)

    partials = pl.pallas_call(
        _centroid_loss_kernel,
        out_shape=jax.ShapeDtypeStruct((num_tiles * 8, LANE), jnp.float32),
        grid_spec=pltpu.PrefetchScalarGridSpec(
            num_scalar_prefetch=0,
            grid=(num_tiles,),
            in_specs=[
                # lambda_l1 scalar lives in SMEM (no recompile per value).
                pl.BlockSpec(memory_space=pltpu.MemorySpace.SMEM),
                # logits / targets: constant block index -> DMA'd once, not
                # once per weight tile.
                pl.BlockSpec((n, c), lambda i: (0, 0)),
                pl.BlockSpec((n, 1), lambda i: (0, 0)),
                # weight tile streamed along the grid axis (double-buffered;
                # 4 MiB/buffer, 8 MiB on v7x).
                pl.BlockSpec((tile_rows, LANE), lambda i: (i, 0)),
            ],
            # lane-dense (8,128) partial-sum block per tile (unmasked stores,
            # disjoint per grid step -> safely core-shardable on v7x).
            out_specs=pl.BlockSpec((8, LANE), lambda i: (i, 0)),
        ),
        compiler_params=pltpu.CompilerParams(
            dimension_semantics=(_weight_axis_semantics(),),
            vmem_limit_bytes=_vmem_limit_bytes(),
        ),
    )(lam, logits, target2d, w_slab)

    # Tiny final reduction of the partials (num_tiles*8 x 128) outside the kernel.
    return jnp.sum(partials)


def _reference_loss(logits, target, conv_weights, lambda_l1):
    logp = jax.nn.log_softmax(logits.astype(jnp.float32), axis=-1)
    ce = -jnp.mean(logp[jnp.arange(logits.shape[0]), target])
    l1 = sum(jnp.sum(jnp.abs(w).astype(jnp.float32)) for w in conv_weights)
    return ce + lambda_l1 * l1


if __name__ == "__main__":
    key = jax.random.PRNGKey(0)
    k1, k2, k3, k4 = jax.random.split(key, 4)

    # Small synthetic setup consistent with the module:
    # a classification head output + two Conv2d layers in "the model".
    N, C = 8, 32
    logits = jax.random.normal(k1, (N, C), jnp.float32)
    target = jax.random.randint(k2, (N,), 0, C, jnp.int32)

    # Deterministic Conv2d weights (OIHW), as would come from model.modules().
    conv_w1 = jax.random.normal(k3, (8, 4, 3, 3), jnp.float32) * 0.1
    conv_w2 = jax.random.normal(k4, (8, 8, 3, 3), jnp.float32) * 0.1
    conv_weights = [conv_w1, conv_w2]

    lambda_l1 = 1e-3
    # lambda_l2 / lambda_g / lambda_c are unused in the forward pass
    # (those regularizers are commented out in the original module).

    # Pack once (amortized across training steps); the kernel only reads the slab.
    w_slab, tile_rows = pack_conv_weights(conv_weights)

    loss = centroid_loss(logits, target, w_slab, tile_rows, lambda_l1)
    loss = jax.block_until_ready(loss)

    ref = _reference_loss(logits, target, conv_weights, lambda_l1)
    np.testing.assert_allclose(np.asarray(loss), np.asarray(ref), rtol=1e-5, atol=1e-5)

    print("KERNEL_OK")
</pallas_src>

<mosaic_0001>
module attributes {stable_mosaic.version = 11 : i64} {
  func.func @_centroid_loss_kernel(%arg0: i32, %arg1: memref<1xf32, #tpu.memory_space<smem>>, %arg2: memref<8x32xf32, #tpu.memory_space<vmem>>, %arg3: memref<8x1xi32, #tpu.memory_space<vmem>>, %arg4: memref<512x128xf32, #tpu.memory_space<vmem>>, %arg5: memref<8x128xf32, #tpu.memory_space<vmem>>) attributes {dimension_semantics = [#tpu.dimension_semantics<parallel>], iteration_bounds = array<i64: 1>, scalar_prefetch = 0 : i64, scratch_operands = 0 : i64, tpu.core_type = #tpu.core_type<tc>, window_params = [{transform_indices = @transform_0, window_bounds = array<i64: 1>}, {pipeline_mode = #tpu.pipeline_mode<synchronous>, transform_indices = @transform_1, window_bounds = array<i64: 8, 32>}, {pipeline_mode = #tpu.pipeline_mode<synchronous>, transform_indices = @transform_2, window_bounds = array<i64: 8, 1>}, {transform_indices = @transform_3, window_bounds = array<i64: 512, 128>}, {transform_indices = @transform_4, window_bounds = array<i64: 8, 128>}]} {
    %c0 = arith.constant 0 : index
    %0 = memref.load %arg1[%c0] : memref<1xf32, #tpu.memory_space<smem>>
    %cst = arith.constant 0.000000e+00 : f32
    %1 = vector.broadcast %cst : f32 to vector<8x128xf32>
    %c0_0 = arith.constant 0 : index
    %c0_1 = arith.constant 0 : index
    %2 = vector.load %arg4[%c0_0, %c0_1] : memref<512x128xf32, #tpu.memory_space<vmem>>, vector<512x128xf32>
    %3 = math.absf %2 : vector<512x128xf32>
    %4 = vector.shape_cast %3 : vector<512x128xf32> to vector<64x8x128xf32>
    %cst_2 = arith.constant dense<0.000000e+00> : vector<8x128xf32>
    %5 = vector.multi_reduction <add>, %4, %cst_2 [0] : vector<64x8x128xf32> to vector<8x128xf32>
    %6 = arith.addf %1, %5 : vector<8x128xf32>
    %7 = vector.broadcast %0 : f32 to vector<8x128xf32>
    %8 = arith.mulf %7, %6 : vector<8x128xf32>
    %c0_i32 = arith.constant 0 : i32
    %9 = arith.cmpi eq, %arg0, %c0_i32 : i32
    %10 = arith.extui %9 : i1 to i32
    %c0_i32_3 = arith.constant 0 : i32
    %11 = arith.cmpi ne, %10, %c0_i32_3 : i32
    scf.if %11 {
      %c0_6 = arith.constant 0 : index
      %c0_7 = arith.constant 0 : index
      %15 = vector.load %arg2[%c0_6, %c0_7] : memref<8x32xf32, #tpu.memory_space<vmem>>, vector<8x32xf32>
      %c0_8 = arith.constant 0 : index
      %c0_9 = arith.constant 0 : index
      %16 = vector.load %arg3[%c0_8, %c0_9] : memref<8x1xi32, #tpu.memory_space<vmem>>, vector<8x1xi32>
      %17 = tpu.iota {dimensions = array<i32: 1>} : vector<8x32xi32>
      %cst_10 = arith.constant dense<0xFF800000> : vector<8xf32>
      %18 = vector.multi_reduction <maximumf>, %15, %cst_10 [1] : vector<8x32xf32> to vector<8xf32>
      %19 = vector.shape_cast %18 : vector<8xf32> to vector<8x1xf32>
      %20 = vector.broadcast %19 : vector<8x1xf32> to vector<8x32xf32>
      %21 = arith.subf %15, %20 : vector<8x32xf32>
      %22 = math.exp %21 : vector<8x32xf32>
      %cst_11 = arith.constant dense<0.000000e+00> : vector<8xf32>
      %23 = vector.multi_reduction <add>, %22, %cst_11 [1] : vector<8x32xf32> to vector<8xf32>
      %24 = vector.shape_cast %23 : vector<8xf32> to vector<8x1xf32>
      %25 = math.log %24 : vector<8x1xf32>
      %26 = arith.addf %19, %25 : vector<8x1xf32>
      %27 = vector.broadcast %16 : vector<8x1xi32> to vector<8x32xi32>
      %28 = arith.cmpi eq, %17, %27 : vector<8x32xi32>
      %cst_12 = arith.constant 0.000000e+00 : f32
      %29 = vector.broadcast %cst_12 : f32 to vector<8x32xf32>
      %30 = arith.select %28, %15, %29 : vector<8x32xi1>, vector<8x32xf32>
      %cst_13 = arith.constant dense<0.000000e+00> : vector<8xf32>
      %31 = vector.multi_reduction <add>, %30, %cst_13 [1] : vector<8x32xf32> to vector<8xf32>
      %32 = vector.shape_cast %31 : vector<8xf32> to vector<8x1xf32>
      %33 = arith.subf %26, %32 : vector<8x1xf32>
      %34 = vector.shape_cast %33 : vector<8x1xf32> to vector<1x8x1xf32>
      %cst_14 = arith.constant dense<0.000000e+00> : vector<1xf32>
      %35 = vector.multi_reduction <add>, %34, %cst_14 [1, 2] : vector<1x8x1xf32> to vector<1xf32>
      %36 = vector.shape_cast %35 : vector<1xf32> to vector<1x1x1xf32>
      %37 = vector.extract %36[0, 0, 0] : f32 from vector<1x1x1xf32>
      %cst_15 = arith.constant 1.250000e-01 : f32
      %38 = arith.mulf %37, %cst_15 : f32
      %39 = tpu.iota {dimensions = array<i32: 0>} : vector<8x128xi32>
      %40 = tpu.iota {dimensions = array<i32: 1>} : vector<8x128xi32>
      %c0_i32_16 = arith.constant 0 : i32
      %41 = vector.broadcast %c0_i32_16 : i32 to vector<8x128xi32>
      %42 = arith.cmpi eq, %39, %41 : vector<8x128xi32>
      %c0_i32_17 = arith.constant 0 : i32
      %43 = vector.broadcast %c0_i32_17 : i32 to vector<8x128xi32>
      %44 = arith.cmpi eq, %40, %43 : vector<8x128xi32>
      %45 = arith.andi %42, %44 : vector<8x128xi1>
      %cst_18 = arith.constant 0.000000e+00 : f32
      %46 = vector.broadcast %38 : f32 to vector<8x128xf32>
      %47 = vector.broadcast %cst_18 : f32 to vector<8x128xf32>
      %48 = arith.select %45, %46, %47 : vector<8x128xi1>, vector<8x128xf32>
      %49 = arith.addf %8, %48 : vector<8x128xf32>
      %c0_19 = arith.constant 0 : index
      %c0_20 = arith.constant 0 : index
      %50 = vector.load %arg5[%c0_19, %c0_20] : memref<8x128xf32, #tpu.memory_space<vmem>>, vector<8x128xf32>
      tpu.vector_store %arg5[%c0_19, %c0_20], %49 {strides = array<i32>} : memref<8x128xf32, #tpu.memory_space<vmem>>, vector<8x128xf32>,
    } else {
    }
    %c0_i32_4 = arith.constant 0 : i32
    %12 = arith.cmpi ne, %arg0, %c0_i32_4 : i32
    %13 = arith.extui %12 : i1 to i32
    %c0_i32_5 = arith.constant 0 : i32
    %14 = arith.cmpi ne, %13, %c0_i32_5 : i32
    scf.if %14 {
      %c0_6 = arith.constant 0 : index
      %c0_7 = arith.constant 0 : index
      %15 = vector.load %arg5[%c0_6, %c0_7] : memref<8x128xf32, #tpu.memory_space<vmem>>, vector<8x128xf32>
      tpu.vector_store %arg5[%c0_6, %c0_7], %8 {strides = array<i32>} : memref<8x128xf32, #tpu.memory_space<vmem>>, vector<8x128xf32>,
    } else {
    }
    return
  }
  func.func @transform_0(%arg0: i32) -> i32 {
    %c0_i32 = arith.constant 0 : i32
    %c0_i32_0 = arith.constant 0 : i32
    return %c0_i32 : i32
  }
  func.func @transform_1(%arg0: i32) -> (i32, i32) {
    %c0_i32 = arith.constant 0 : i32
    %c0_i32_0 = arith.constant 0 : i32
    %c0_i32_1 = arith.constant 0 : i32
    return %c0_i32, %c0_i32_0 : i32, i32
  }
  func.func @transform_2(%arg0: i32) -> (i32, i32) {
    %c0_i32 = arith.constant 0 : i32
    %c0_i32_0 = arith.constant 0 : i32
    %c0_i32_1 = arith.constant 0 : i32
    return %c0_i32, %c0_i32_0 : i32, i32
  }
  func.func @transform_3(%arg0: i32) -> (i32, i32) {
    %c0_i32 = arith.constant 0 : i32
    %c0_i32_0 = arith.constant 0 : i32
    return %arg0, %c0_i32 : i32, i32
  }
  func.func @transform_4(%arg0: i32) -> (i32, i32) {
    %c0_i32 = arith.constant 0 : i32
    %c0_i32_0 = arith.constant 0 : i32
    return %arg0, %c0_i32 : i32, i32
  }
}

</mosaic_0001>

<bundles_post_ra>
// kernel: tpu_custom_call.1
= control target key start
LH: loop header
LB: loop body
LE: loop exit
PB: predicated region body
PF: predicated region fallthrough
CT: control target
= control target key end

     0   :  { %10 = vsyncpa [#allocation4], 0  ;;  %s409_s0 = inlined_call_operand.<no memory space> [shape: f32[1], index: 0, kind: input, shape index: {}]   ;;  %s410_s1 = inlined_call_operand.vmem [shape: f32[8,32], index: 1, kind: input, shape index: {}]   ;;  %s411_s2 = inlined_call_operand.vmem [shape: s32[8,1], index: 2, kind: input, shape index: {}]   ;;  %s412_s3 = inlined_call_operand.hbm [shape: f32[512,128], index: 3, kind: input, shape index: {}]   ;;  %s413_s4 = inlined_call_operand.hbm [shape: f32[8,128], index: 4, kind: output, shape index: {}]  }
   0x1   :  { %11 = vsyncpa [#allocation5], 0  ;;  %s355_s15 = smov [#allocation3]  }
   0x2   :  { %s23_s16 = sshll.u32 %s355_s15, 4  ;;  %s24_s16 = int_to_ptr.vmem [resolvable:$true] %s23_s16 }
   0x3   :  { %s319_s17 = scalar_lea.vmem %s24_s16, 8192  ;;  %p324_p1 = scmp.lt.s32.totalorder %s24_s16, %s24_s16 }
   0x4   :  { %p320_p0 = scmp.ne.s32.totalorder %s24_s16, %s319_s17  ;;  %p325_p2 = scmp.lt.s32.totalorder %s319_s17, %s319_s17 }
   0x6   :  { %p326_p3 = por %p325_p2, %p324_p1 }
   0x8   :  { %p327_p4 = pnand %p326_p3, %p320_p0 }
   0xa   :  { %330 = shalt.err (!%p327_p4)
}
   0xb   :  { %s356_s18 = smov 128   ;;  %s357_s19 = smov 8  }
   0xc   :  { %29 = dma.hbm_to_vmem [thread:$0]  %s412_s3, 8192, %s24_s16, [#allocation4], %s356_s18, %s356_s18, %s357_s19  }
   0xd   :  { %351 = dma.done.wait [#allocation4], 8192  }
   0xe   :  { %352 = vsyncadd [#allocation4], 4294959104  ;;  %v358_v0 = vmov 0   ;;  %vm236_vm0 = vcmask 261120   ;;  %v232_v1 = vld [vmem:[%s410_s1] sm:$0xff]  ;;  %v234_v7 = vlaneseq  ;;  %v35_v15 = vld [vmem:[#allocation3 + $0x8] sm:$0xff] }
   0xf   :  { %306 = vset.pattern.permute.xlu0 %v358_v0  ;;  %v237_v2 = vsel %vm236_vm0, %v232_v1, -inf  ;;  %v233_v3 = vld [vmem:[%s411_s2] sm:$0xff]  ;;  %v99_v17 = vand.u32 2147483647, %v35_v15  ;;  %v36_v18 = vld [vmem:[#allocation3 + $0x10] sm:$0xff]  ;;  %v37_v21 = vld [vmem:[#allocation3 + $0x18] sm:$0xff] }
  0x10   :  { %238 = vmax.xlane.f32.xlu0 %v237_v2  ;;  %v396_v8 = vand.u32 127, %v234_v7  ;;  %v34_v14 = vld [vmem:[#allocation3] sm:$0xff]  ;;  %v100_v19 = vand.u32 2147483647, %v36_v18  ;;  %v101_v22 = vand.u32 2147483647, %v37_v21 }
  0x11   :  { %v98_v16 = vand.u32 2147483647, %v34_v14  ;;  %v38_v24 = vld [vmem:[#allocation3 + $0x20] sm:$0xff]  ;;  %v39_v27 = vld [vmem:[#allocation3 + $0x28] sm:$0xff]  ;;  %v40_v30 = vld [vmem:[#allocation3 + $0x30] sm:$0xff]  ;;  %vm258_vm2 = vcmask 7168  }
  0x12   :  { %v102_v25 = vand.u32 2147483647, %v38_v24  ;;  %v103_v28 = vand.u32 2147483647, %v39_v27  ;;  %v104_v31 = vand.u32 2147483647, %v40_v30 }
  0x13   :  { %v162_v20 = vadd.f32 %v99_v17, %v98_v16  ;;  %v41_v33 = vld [vmem:[#allocation3 + $0x38] sm:$0xff]  ;;  %v42_v36 = vld [vmem:[#allocation3 + $0x40] sm:$0xff]  ;;  %v43_v39 = vld [vmem:[#allocation3 + $0x48] sm:$0xff]  ;;  %vm273_vm4 = vcmp.eq.s32.totalorder %v396_v8, 0  ;;  %s359_s27 = smov [#allocation6]  }
  0x14   :  { %v105_v34 = vand.u32 2147483647, %v41_v33  ;;  %v106_v37 = vand.u32 2147483647, %v42_v36  ;;  %v107_v40 = vand.u32 2147483647, %v43_v39 }
  0x15   :  { %v163_v23 = vadd.f32 %v162_v20, %v100_v19  ;;  %v44_v42 = vld [vmem:[#allocation3 + $0x50] sm:$0xff]  ;;  %v45_v46 = vld [vmem:[#allocation3 + $0x58] sm:$0xff]  ;;  %v46_v49 = vld [vmem:[#allocation3 + $0x60] sm:$0xff]  ;;  %s290_s28 = sshll.u32 %s359_s27, 4  ;;  %s291_s28 = int_to_ptr.vmem [resolvable:$true] %s290_s28 }
  0x16   :  { %v108_v44 = vand.u32 2147483647, %v44_v42  ;;  %v109_v47 = vand.u32 2147483647, %v45_v46  ;;  %v110_v50 = vand.u32 2147483647, %v46_v49  ;;  %p336_p6 = scmp.lt.s32.totalorder %s291_s28, %s291_s28 }
  0x17   :  { %v164_v26 = vadd.f32 %v163_v23, %v101_v22  ;;  %v47_v52 = vld [vmem:[#allocation3 + $0x68] sm:$0xff]  ;;  %v48_v57 = vld [vmem:[#allocation3 + $0x70] sm:$0xff]  ;;  %v49_v63 = vld [vmem:[#allocation3 + $0x78] sm:$0xff]  ;;  %s331_s29 = scalar_lea.vmem %s291_s28, 128 }
  0x18   :  { %v111_v54 = vand.u32 2147483647, %v47_v52  ;;  %v112_v60 = vand.u32 2147483647, %v48_v57  ;;  %v53_v15 = vld [vmem:[#allocation3 + $0x98] sm:$0xff]  ;;  %v54_v17 = vld [vmem:[#allocation3 + $0xa0] sm:$0xff]  ;;  %p332_p5 = scmp.ne.s32.totalorder %s291_s28, %s331_s29  ;;  %p337_p7 = scmp.lt.s32.totalorder %s331_s29, %s331_s29 }
  0x19   :  { %v165_v29 = vadd.f32 %v164_v26, %v102_v25  ;;  %v118_v18 = vand.u32 2147483647, %v54_v17  ;;  %v55_v20 = vld [vmem:[#allocation3 + $0xa8] sm:$0xff]  ;;  %v56_v23 = vld [vmem:[#allocation3 + $0xb0] sm:$0xff]  ;;  %v57_v26 = vld [vmem:[#allocation3 + $0xb8] sm:$0xff] }
  0x1a   :  { %v119_v21 = vand.u32 2147483647, %v55_v20  ;;  %v120_v24 = vand.u32 2147483647, %v56_v23  ;;  %v121_v27 = vand.u32 2147483647, %v57_v26  ;;  %p338_p8 = por %p337_p7, %p336_p6 }
  0x1b   :  { %v166_v32 = vadd.f32 %v165_v29, %v103_v28  ;;  %v58_v29 = vld [vmem:[#allocation3 + $0xc0] sm:$0xff] }
  0x1c   :  { %v122_v30 = vand.u32 2147483647, %v58_v29  ;;  %p339_p9 = pnand %p338_p8, %p332_p5 }
  0x1d   :  { %v167_v35 = vadd.f32 %v166_v32, %v104_v31  ;;  %v59_v32 = vld [vmem:[#allocation3 + $0xc8] sm:$0xff] }
  0x1e   :  { %v123_v33 = vand.u32 2147483647, %v59_v32 }
  0x1f   :  { %v168_v38 = vadd.f32 %v167_v35, %v105_v34  ;;  %v60_v35 = vld [vmem:[#allocation3 + $0xd0] sm:$0xff] }
  0x20   :  { %v124_v36 = vand.u32 2147483647, %v60_v35 }
  0x21   :  { %v169_v41 = vadd.f32 %v168_v38, %v106_v37  ;;  %v61_v38 = vld [vmem:[#allocation3 + $0xd8] sm:$0xff] }
  0x22   :  { %v125_v39 = vand.u32 2147483647, %v61_v38 }
  0x23   :  { %v170_v45 = vadd.f32 %v169_v41, %v107_v40  ;;  %v62_v41 = vld [vmem:[#allocation3 + $0xe0] sm:$0xff] }
  0x24   :  { %v126_v42 = vand.u32 2147483647, %v62_v41 }
  0x25   :  { %v171_v48 = vadd.f32 %v170_v45, %v108_v44  ;;  %v63_v44 = vld [vmem:[#allocation3 + $0xe8] sm:$0xff] }
  0x26   :  { %250 = vperm.xlu0 %306, %v233_v3   ;;  %v50_v3 = vld [vmem:[#allocation3 + $0x80] sm:$0xff]  ;;  %v127_v45 = vand.u32 2147483647, %v63_v44 }
  0x27   :  { %v172_v51 = vadd.f32 %v171_v48, %v109_v47  ;;  %v64_v47 = vld [vmem:[#allocation3 + $0xf0] sm:$0xff] }
  0x28   :  { %v128_v48 = vand.u32 2147483647, %v64_v47 }
  0x29   :  { %v173_v55 = vadd.f32 %v172_v51, %v110_v50  ;;  %v65_v50 = vld [vmem:[#allocation3 + $0xf8] sm:$0xff] }
  0x2a   :  { %v129_v51 = vand.u32 2147483647, %v65_v50 }
  0x2b   :  { %v174_v61 = vadd.f32 %v173_v55, %v111_v54 }
  0x2d   :  { %v175_v2 = vadd.f32 %v174_v61, %v112_v60 }
  0x99   :  { %v239_v4 = vpop.xlane.xlu0 %238 }
  0x9a   :  { %v240_v5 = vsub.f32 %v232_v1, %v239_v4 }
  0x9c   :  { %v241_v6 = vmul.f32 1.442695, %v240_v5  ;;  %v114_v5 = vand.u32 2147483647, %v50_v3 }
  0x9e   :  { %307 = vpow2.f32 %v241_v6 }
  0xa1   :  { %v251_v9 = vpop.permute.xlu0 %250 }
  0xa2   :  { %vm252_vm1 = vcmp.eq.s32.totalorder %v396_v8, %v251_v9  ;;  %v51_v9 = vld [vmem:[#allocation3 + $0x88] sm:$0xff] }
  0xa3   :  { %v253_v11 = vsel %vm252_vm1, %v232_v1, 0.0  ;;  %v113_v1 = vand.u32 2147483647, %v49_v63 }
  0xa4   :  { %v254_v13 = vsel %vm236_vm0, %v253_v11, 0.0 }
  0xa5   :  { %v176_v6 = vadd.f32 %v175_v2, %v113_v1  ;;  %v70_v1 = vld [vmem:[#allocation3 + $0x120] sm:$0xff] }
  0xa6   :  { %v134_v2 = vand.u32 2147483647, %v70_v1 }
  0xa7   :  { %v177_v11 = vadd.f32 %v176_v6, %v114_v5  ;;  %v71_v5 = vld [vmem:[#allocation3 + $0x128] sm:$0xff] }
  0xa8   :  { %v135_v6 = vand.u32 2147483647, %v71_v5 }
  0xab   :  { %v308_v10 = vpop.eup %307 }
  0xac   :  { %v243_v12 = vsel %vm236_vm0, %v308_v10, 0.0  ;;  %v115_v10 = vand.u32 2147483647, %v51_v9 }
  0xad   :  { %244 = vadd.xlane.f32.xlu1 %v243_v12  ;;  %v52_v12 = vld [vmem:[#allocation3 + $0x90] sm:$0xff] }
  0xae   :  { %v178_v14 = vadd.f32 %v177_v11, %v115_v10  ;;  %v72_v10 = vld [vmem:[#allocation3 + $0x130] sm:$0xff] }
  0xaf   :  { %v136_v11 = vand.u32 2147483647, %v72_v10 }
  0xb1   :  { %255 = vadd.xlane.f32.xlu1 %v254_v13  ;;  %v116_v13 = vand.u32 2147483647, %v52_v12 }
  0xb3   :  { %v179_v16 = vadd.f32 %v178_v14, %v116_v13  ;;  %v73_v13 = vld [vmem:[#allocation3 + $0x138] sm:$0xff] }
  0xb4   :  { %v137_v14 = vand.u32 2147483647, %v73_v13 }
 0x136   :  { %v245_v43 = vpop.xlane.xlu1 %244 }
 0x137   :  { %309 = vlog2.f32 %v245_v43 }
 0x13a   :  { %v256_v58 = vpop.xlane.xlu1 %255 }
 0x144   :  { %v310_v53 = vpop.eup %309 }
 0x145   :  { %v247_v56 = vmul.f32 0.6931472, %v310_v53  ;;  %v66_v53 = vld [vmem:[#allocation3 + $0x100] sm:$0xff] }
 0x146   :  { %v130_v54 = vand.u32 2147483647, %v66_v53 }
 0x147   :  { %v248_v59 = vadd.f32 %v247_v56, %v239_v4  ;;  %v117_v4 = vand.u32 2147483647, %v53_v15  ;;  %v67_v56 = vld [vmem:[#allocation3 + $0x108] sm:$0xff] }
 0x148   :  { %v131_v57 = vand.u32 2147483647, %v67_v56  ;;  %v86_v56 = vld [vmem:[#allocation3 + $0x1a0] sm:$0xff] }
 0x149   :  { %v257_v62 = vsub.f32 %v248_v59, %v256_v58  ;;  %v180_v19 = vadd.f32 %v179_v16, %v117_v4  ;;  %v68_v59 = vld [vmem:[#allocation3 + $0x110] sm:$0xff]  ;;  %v74_v4 = vld [vmem:[#allocation3 + $0x140] sm:$0xff] }
 0x14a   :  { %v132_v60 = vand.u32 2147483647, %v68_v59  ;;  %v138_v16 = vand.u32 2147483647, %v74_v4  ;;  %v150_v59 = vand.u32 2147483647, %v86_v56 }
 0x14b   :  { %v259_v0 = vsel %vm258_vm2, %v257_v62, 0.0  ;;  %v181_v22 = vadd.f32 %v180_v19, %v118_v18  ;;  %v69_v62 = vld [vmem:[#allocation3 + $0x118] sm:$0xff]  ;;  %v75_v18 = vld [vmem:[#allocation3 + $0x148] sm:$0xff] }
 0x14c   :  { %260 = vadd.xlane.f32.xlu1 %v259_v0  ;;  %v133_v63 = vand.u32 2147483647, %v69_v62  ;;  %v139_v19 = vand.u32 2147483647, %v75_v18 }
 0x14d   :  { %v182_v25 = vadd.f32 %v181_v22, %v119_v21  ;;  %v76_v21 = vld [vmem:[#allocation3 + $0x150] sm:$0xff] }
 0x14e   :  { %v140_v22 = vand.u32 2147483647, %v76_v21 }
 0x14f   :  { %v183_v28 = vadd.f32 %v182_v25, %v120_v24  ;;  %v77_v24 = vld [vmem:[#allocation3 + $0x158] sm:$0xff] }
 0x150   :  { %v141_v25 = vand.u32 2147483647, %v77_v24 }
 0x151   :  { %v184_v31 = vadd.f32 %v183_v28, %v121_v27  ;;  %v78_v27 = vld [vmem:[#allocation3 + $0x160] sm:$0xff] }
 0x152   :  { %v142_v28 = vand.u32 2147483647, %v78_v27 }
 0x153   :  { %v185_v34 = vadd.f32 %v184_v31, %v122_v30  ;;  %v79_v30 = vld [vmem:[#allocation3 + $0x168] sm:$0xff] }
 0x154   :  { %v143_v31 = vand.u32 2147483647, %v79_v30 }
 0x155   :  { %v186_v37 = vadd.f32 %v185_v34, %v123_v33  ;;  %v80_v33 = vld [vmem:[#allocation3 + $0x170] sm:$0xff] }
 0x156   :  { %v144_v34 = vand.u32 2147483647, %v80_v33 }
 0x157   :  { %v187_v40 = vadd.f32 %v186_v37, %v124_v36  ;;  %v81_v36 = vld [vmem:[#allocation3 + $0x178] sm:$0xff] }
 0x158   :  { %v145_v37 = vand.u32 2147483647, %v81_v36 }
 0x159   :  { %v188_v43 = vadd.f32 %v187_v40, %v125_v39  ;;  %v82_v39 = vld [vmem:[#allocation3 + $0x180] sm:$0xff] }
 0x15a   :  { %v146_v40 = vand.u32 2147483647, %v82_v39 }
 0x15b   :  { %v189_v46 = vadd.f32 %v188_v43, %v126_v42  ;;  %v83_v42 = vld [vmem:[#allocation3 + $0x188] sm:$0xff] }
 0x15c   :  { %v147_v43 = vand.u32 2147483647, %v83_v42 }
 0x15d   :  { %v190_v49 = vadd.f32 %v189_v46, %v127_v45  ;;  %v84_v46 = vld [vmem:[#allocation3 + $0x190] sm:$0xff] }
 0x15f   :  { %v191_v52 = vadd.f32 %v190_v49, %v128_v48  ;;  %v148_v49 = vand.u32 2147483647, %v84_v46 }
 0x161   :  { %v192_v55 = vadd.f32 %v191_v52, %v129_v51  ;;  %v85_v51 = vld [vmem:[#allocation3 + $0x198] sm:$0xff] }
 0x163   :  { %v193_v58 = vadd.f32 %v192_v55, %v130_v54  ;;  %v149_v54 = vand.u32 2147483647, %v85_v51 }
 0x165   :  { %v194_v61 = vadd.f32 %v193_v58, %v131_v57 }
 0x167   :  { %v195_v0 = vadd.f32 %v194_v61, %v132_v60  ;;  %v87_v61 = vld [vmem:[#allocation3 + $0x1a8] sm:$0xff] }
 0x168   :  { %v151_v62 = vand.u32 2147483647, %v87_v61 }
 0x169   :  { %v196_v3 = vadd.f32 %v195_v0, %v133_v63  ;;  %v88_v0 = vld [vmem:[#allocation3 + $0x1b0] sm:$0xff] }
 0x16a   :  { %v152_v1 = vand.u32 2147483647, %v88_v0 }
 0x16b   :  { %v197_v9 = vadd.f32 %v196_v3, %v134_v2  ;;  %v89_v3 = vld [vmem:[#allocation3 + $0x1b8] sm:$0xff] }
 0x16c   :  { %v153_v5 = vand.u32 2147483647, %v89_v3 }
 0x16d   :  { %v198_v12 = vadd.f32 %v197_v9, %v135_v6  ;;  %v90_v9 = vld [vmem:[#allocation3 + $0x1c0] sm:$0xff] }
 0x16e   :  { %v154_v10 = vand.u32 2147483647, %v90_v9 }
 0x16f   :  { %v199_v15 = vadd.f32 %v198_v12, %v136_v11  ;;  %v91_v12 = vld [vmem:[#allocation3 + $0x1c8] sm:$0xff] }
 0x170   :  { %v155_v13 = vand.u32 2147483647, %v91_v12 }
 0x171   :  { %v200_v17 = vadd.f32 %v199_v15, %v137_v14  ;;  %v92_v15 = vld [vmem:[#allocation3 + $0x1d0] sm:$0xff] }
 0x172   :  { %v156_v4 = vand.u32 2147483647, %v92_v15 }
 0x173   :  { %v201_v20 = vadd.f32 %v200_v17, %v138_v16  ;;  %v93_v17 = vld [vmem:[#allocation3 + $0x1d8] sm:$0xff] }
 0x174   :  { %v157_v18 = vand.u32 2147483647, %v93_v17 }
 0x175   :  { %v202_v23 = vadd.f32 %v201_v20, %v139_v19  ;;  %v94_v20 = vld [vmem:[#allocation3 + $0x1e0] sm:$0xff] }
 0x176   :  { %v158_v21 = vand.u32 2147483647, %v94_v20 }
 0x177   :  { %v203_v26 = vadd.f32 %v202_v23, %v140_v22  ;;  %v95_v23 = vld [vmem:[#allocation3 + $0x1e8] sm:$0xff] }
 0x178   :  { %v159_v24 = vand.u32 2147483647, %v95_v23 }
 0x179   :  { %v204_v29 = vadd.f32 %v203_v26, %v141_v25  ;;  %v96_v26 = vld [vmem:[#allocation3 + $0x1f0] sm:$0xff] }
 0x17a   :  { %v160_v27 = vand.u32 2147483647, %v96_v26 }
 0x17b   :  { %v205_v32 = vadd.f32 %v204_v29, %v142_v28  ;;  %v97_v29 = vld [vmem:[#allocation3 + $0x1f8] sm:$0xff] }
 0x17c   :  { %v161_v30 = vand.u32 2147483647, %v97_v29 }
 0x17d   :  { %v206_v35 = vadd.f32 %v205_v32, %v143_v31  ;;  %v271_v32 = vshrl.u32 %v234_v7, 7 }
 0x17f   :  { %v207_v38 = vadd.f32 %v206_v35, %v144_v34  ;;  %v226_v34 = vstv %s409_s0  ;;  %vm272_vm3 = vcmp.eq.s32.totalorder %v271_v32, 0 }
 0x180   :  { %vm274_vm5 = vmand %vm272_vm3, %vm273_vm4 }
 0x181   :  { %v208_v41 = vadd.f32 %v207_v38, %v145_v37 }
 0x183   :  { %v209_v44 = vadd.f32 %v208_v41, %v146_v40 }
 0x185   :  { %v210_v50 = vadd.f32 %v209_v44, %v147_v43 }
 0x187   :  { %v211_v55 = vadd.f32 %v210_v50, %v148_v49 }
 0x189   :  { %v212_v60 = vadd.f32 %v211_v55, %v149_v54 }
 0x18b   :  { %v213_v63 = vadd.f32 %v212_v60, %v150_v59 }
 0x18d   :  { %v214_v2 = vadd.f32 %v213_v63, %v151_v62 }
 0x18f   :  { %v215_v6 = vadd.f32 %v214_v2, %v152_v1 }
 0x191   :  { %v216_v11 = vadd.f32 %v215_v6, %v153_v5 }
 0x193   :  { %v217_v14 = vadd.f32 %v216_v11, %v154_v10 }
 0x195   :  { %v218_v16 = vadd.f32 %v217_v14, %v155_v13 }
 0x197   :  { %v219_v19 = vadd.f32 %v218_v16, %v156_v4 }
 0x199   :  { %v220_v22 = vadd.f32 %v219_v19, %v157_v18 }
 0x19b   :  { %v221_v25 = vadd.f32 %v220_v22, %v158_v21 }
 0x19d   :  { %v222_v28 = vadd.f32 %v221_v25, %v159_v24 }
 0x19f   :  { %v223_v31 = vadd.f32 %v222_v28, %v160_v27 }
 0x1a1   :  { %v224_v33 = vadd.f32 %v223_v31, %v161_v30 }
 0x1a3   :  { %v227_v35 = vmul.f32 %v226_v34, %v224_v33 }
 0x1d5   :  { %v261_v45 = vpop.xlane.xlu1 %260 }
 0x1d6   :  { %v262_v47 = vrot.slane %v261_v45, 4 }
 0x1d8   :  { %v263_v48 = vadd.f32 %v262_v47, %v261_v45 }
 0x1da   :  { %v264_v52 = vrot.slane %v263_v48, 2 }
 0x1dc   :  { %v265_v53 = vadd.f32 %v264_v52, %v263_v48 }
 0x1de   :  { %v266_v57 = vrot.slane %v265_v53, 1 }
 0x1e0   :  { %v267_v58 = vadd.f32 %v266_v57, %v265_v53 }
 0x1e2   :  { %299 = vpush %v267_v58 }
 0x213   :  { %s300_s3 = spop %299 }
 0x214   :  { %s269_s26 = smul.f32 0.125, %s300_s3 }
 0x216   :  { %v275_v36 = vstv %s269_s26 }
 0x217   :  { %v276_v37 = vsel %vm274_vm5, %v275_v36, 0.0 }
 0x218   :  { %v277_v38 = vadd.f32 %v276_v37, %v227_v35 }
 0x21a   :  { %278 = vst [vmem:[#allocation6] sm:$0xff] %v277_v38 }
 0x21b   :  { %342 = shalt.err (!%p339_p9)
}
 0x21c   :  { %293 = dma.vmem_to_hbm [thread:$0]  %s291_s28, 128, %s413_s4, [#allocation5]  }
 0x21d   :  { %353 = dma.done.wait [#allocation5], 128  }
 0x21e   :  { %354 = vsyncadd [#allocation5], 4294967168 }
 0x21f   :  { %297 = vsyncpa [#allocation4], 1 }
 0x220   :  { %298 = vsyncpa [#allocation5], 1 }

</bundles_post_ra>
